<compile_context>
chip_gen: v7x
topology: tpu7x:2x2x1
jax: 0.10.0
libtpu: 0.0.40
codegen_flags: <defaults>
</compile_context>

<pallas_src>
import functools

import jax
import jax.numpy as jnp
from jax.experimental import pallas as pl
from jax.experimental.pallas import tpu as pltpu

K_IN = 60          # timeseries * movement
K_PAD = 64         # lane-friendly padded K for the first matmul
TILE_M_MAX = 1024  # rows per grid step; keeps VMEM bounded for any N


def critic_mlp_kernel(x_ref, w1_ref, b1_ref, w2_ref, b2_ref,
                      w3_ref, b3_ref, w4_ref, b4_ref, o_ref):
    # fc1: bf16 operands, f32 accumulate; bias / relu in f32.
    h = jnp.dot(x_ref[...], w1_ref[...], preferred_element_type=jnp.float32)
    h = jnp.maximum(h + b1_ref[...], 0.0)
    # fc2
    h = jnp.dot(h.astype(jnp.bfloat16), w2_ref[...],
                preferred_element_type=jnp.float32)
    h = jnp.maximum(h + b2_ref[...], 0.0)
    # fc3
    h = jnp.dot(h.astype(jnp.bfloat16), w3_ref[...],
                preferred_element_type=jnp.float32)
    h = jnp.maximum(h + b3_ref[...], 0.0)
    # fc4 (64 -> 1): VPU multiply + XLU lane reduction, no 1-wide MXU pass.
    out = jnp.sum(h * w4_ref[...], axis=-1, keepdims=True) + b4_ref[...]
    o_ref[...] = out.astype(o_ref.dtype)


def critic_mlp_pallas(x2d, w1, b1, w2, b2, w3, b3, w4t, b4, *, tile_m):
    """x2d: (N_pad, K_PAD) bf16 with N_pad a multiple of tile_m."""
    n_pad = x2d.shape[0]
    grid = (pl.cdiv(n_pad, tile_m),)
    const2d = lambda i: (0, 0)
    in_specs = [
        pl.BlockSpec((tile_m, K_PAD), lambda i: (i, 0)),   # x: row-tiled
        pl.BlockSpec(w1.shape, const2d), pl.BlockSpec(b1.shape, const2d),
        pl.BlockSpec(w2.shape, const2d), pl.BlockSpec(b2.shape, const2d),
        pl.BlockSpec(w3.shape, const2d), pl.BlockSpec(b3.shape, const2d),
        pl.BlockSpec(w4t.shape, const2d), pl.BlockSpec(b4.shape, const2d),
    ]
    return pl.pallas_call(
        critic_mlp_kernel,
        out_shape=jax.ShapeDtypeStruct((n_pad, 1), jnp.float32),
        grid=grid,
        in_specs=in_specs,
        out_specs=pl.BlockSpec((tile_m, 1), lambda i: (i, 0)),
        compiler_params=pltpu.CompilerParams(
            dimension_semantics=("parallel",)),
    )(x2d, w1, b1, w2, b2, w3, b3, w4t, b4)


def _round_up(v, m):
    return (v + m - 1) // m * m


@functools.partial(jax.jit, static_argnames=("tile_m_max",))
def _critic_forward_jit(x_local, params, tile_m_max=TILE_M_MAX):
    env_batch_nagents = x_local.shape[:-3]
    timeseries, movement, _feature_num = x_local.shape[-3:]
    assert timeseries * movement == K_IN
    w1, b1, w2, b2, w3, b3, w4, b4 = params

    # Take feature channel 0, flatten leading dims + (T, M); slice / cast / pad
    # fuse inside this jit so x is only streamed once on the XLA side.
    x2d = x_local[..., 0].reshape(-1, K_IN).astype(jnp.float32)
    n = x2d.shape[0]
    tile_m = min(tile_m_max, _round_up(n, 8))
    n_pad = _round_up(n, tile_m)
    x2d = jnp.pad(x2d, ((0, n_pad - n), (0, K_PAD - K_IN))).astype(jnp.bfloat16)

    # bf16 matmul operands (f32 accumulation inside the kernel); biases and the
    # VPU head stay f32.
    w1p = jnp.pad(w1, ((0, K_PAD - K_IN), (0, 0))).astype(jnp.bfloat16)
    w2b = w2.astype(jnp.bfloat16)
    w3b = w3.astype(jnp.bfloat16)
    w4t = w4.T  # (1, 64) f32 row for the VPU head

    out = critic_mlp_pallas(x2d, w1p, b1, w2b, b2, w3b, b3, w4t, b4,
                            tile_m=tile_m)
    return out[:n].reshape(*env_batch_nagents, -1)


def critic_forward(x_dict, params, tile_m_max=TILE_M_MAX):
    """Mirrors CriticNetwork.forward for x = {'local': [..., T, M, F]}."""
    return _critic_forward_jit(x_dict["local"], tuple(params),
                               tile_m_max=tile_m_max)


def init_params(key):
    """PyTorch-Linear-style init: U(-1/sqrt(fan_in), 1/sqrt(fan_in))."""
    layer_sizes = [(60, 256), (256, 128), (128, 64), (64, 1)]
    params = []
    for fan_in, fan_out in layer_sizes:
        key, kw, kb = jax.random.split(key, 3)
        bound = 1.0 / float(fan_in) ** 0.5
        w = jax.random.uniform(kw, (fan_in, fan_out), jnp.float32, -bound, bound)
        b = jax.random.uniform(kb, (1, fan_out), jnp.float32, -bound, bound)
        params += [w, b]
    return params


def _reference(x_local, params):
    """Pure-JAX f32 reference of the same forward pass."""
    w1, b1, w2, b2, w3, b3, w4, b4 = params
    t, m, _ = x_local.shape[-3:]
    h = x_local[..., 0].reshape(-1, t * m).astype(jnp.float32)
    h = jnp.maximum(h @ w1 + b1, 0.0)
    h = jnp.maximum(h @ w2 + b2, 0.0)
    h = jnp.maximum(h @ w3 + b3, 0.0)
    return (h @ w4 + b4).reshape(*x_local.shape[:-3], -1)


if __name__ == "__main__":
    key = jax.random.PRNGKey(0)
    key, kp, k1, k2 = jax.random.split(key, 4)
    params = init_params(kp)

    # Case 1: env_batch_nagents=(2,3); T=12, M=5 (12*5=60), feature_num=4.
    x_a = jax.random.normal(k1, (2, 3, 12, 5, 4), dtype=jnp.float32)
    out_a = jax.block_until_ready(critic_forward({"local": x_a}, params))
    assert out_a.shape == (2, 3, 1), out_a.shape
    assert out_a.dtype == jnp.float32
    ref_a = _reference(x_a, params)
    assert jnp.allclose(out_a, ref_a, atol=5e-2, rtol=1e-1), (
        float(jnp.max(jnp.abs(out_a - ref_a))))

    # Case 2: exercise the multi-tile grid path (N=48, tile_m=8 -> 6 tiles,
    # weights stay VMEM-resident across tiles).
    x_b = jax.random.normal(k2, (6, 8, 12, 5, 4), dtype=jnp.float32)
    out_b = jax.block_until_ready(
        critic_forward({"local": x_b}, params, tile_m_max=8))
    assert out_b.shape == (6, 8, 1), out_b.shape
    ref_b = _reference(x_b, params)
    assert jnp.allclose(out_b, ref_b, atol=5e-2, rtol=1e-1), (
        float(jnp.max(jnp.abs(out_b - ref_b))))

    print("KERNEL_OK")
</pallas_src>

<mosaic_0001>
module attributes {stable_mosaic.version = 11 : i64} {
  func.func @critic_mlp_kernel(%arg0: i32, %arg1: memref<8x64xbf16, #tpu.memory_space<vmem>>, %arg2: memref<64x256xbf16, #tpu.memory_space<vmem>>, %arg3: memref<1x256xf32, #tpu.memory_space<vmem>>, %arg4: memref<256x128xbf16, #tpu.memory_space<vmem>>, %arg5: memref<1x128xf32, #tpu.memory_space<vmem>>, %arg6: memref<128x64xbf16, #tpu.memory_space<vmem>>, %arg7: memref<1x64xf32, #tpu.memory_space<vmem>>, %arg8: memref<1x64xf32, #tpu.memory_space<vmem>>, %arg9: memref<1x1xf32, #tpu.memory_space<vmem>>, %arg10: memref<8x1xf32, #tpu.memory_space<vmem>>) attributes {dimension_semantics = [#tpu.dimension_semantics<parallel>], iteration_bounds = array<i64: 1>, scalar_prefetch = 0 : i64, scratch_operands = 0 : i64, tpu.core_type = #tpu.core_type<tc>, window_params = [{transform_indices = @transform_0, window_bounds = array<i64: 8, 64>}, {pipeline_mode = #tpu.pipeline_mode<synchronous>, transform_indices = @transform_1, window_bounds = array<i64: 64, 256>}, {pipeline_mode = #tpu.pipeline_mode<synchronous>, transform_indices = @transform_2, window_bounds = array<i64: 1, 256>}, {pipeline_mode = #tpu.pipeline_mode<synchronous>, transform_indices = @transform_3, window_bounds = array<i64: 256, 128>}, {pipeline_mode = #tpu.pipeline_mode<synchronous>, transform_indices = @transform_4, window_bounds = array<i64: 1, 128>}, {pipeline_mode = #tpu.pipeline_mode<synchronous>, transform_indices = @transform_5, window_bounds = array<i64: 128, 64>}, {pipeline_mode = #tpu.pipeline_mode<synchronous>, transform_indices = @transform_6, window_bounds = array<i64: 1, 64>}, {pipeline_mode = #tpu.pipeline_mode<synchronous>, transform_indices = @transform_7, window_bounds = array<i64: 1, 64>}, {pipeline_mode = #tpu.pipeline_mode<synchronous>, transform_indices = @transform_8, window_bounds = array<i64: 1, 1>}, {transform_indices = @transform_9, window_bounds = array<i64: 8, 1>}]} {
    %c0 = arith.constant 0 : index
    %c0_0 = arith.constant 0 : index
    %0 = vector.load %arg1[%c0, %c0_0] : memref<8x64xbf16, #tpu.memory_space<vmem>>, vector<8x64xbf16>
    %c0_1 = arith.constant 0 : index
    %c0_2 = arith.constant 0 : index
    %1 = vector.load %arg2[%c0_1, %c0_2] : memref<64x256xbf16, #tpu.memory_space<vmem>>, vector<64x256xbf16>
    %cst = arith.constant dense<0.000000e+00> : vector<8x256xf32>
    %2 = tpu.matmul %0, %1, %cst {dimension_numbers = #tpu.dot_dimension_numbers<[1], [0], [0], [1], [0, 0, 1, 1], [], []>} : vector<8x64xbf16>, vector<64x256xbf16>, vector<8x256xf32> -> vector<8x256xf32>
    %c0_3 = arith.constant 0 : index
    %c0_4 = arith.constant 0 : index
    %3 = vector.load %arg3[%c0_3, %c0_4] : memref<1x256xf32, #tpu.memory_space<vmem>>, vector<1x256xf32>
    %4 = vector.broadcast %3 : vector<1x256xf32> to vector<8x256xf32>
    %5 = arith.addf %2, %4 : vector<8x256xf32>
    %cst_5 = arith.constant 0.000000e+00 : f32
    %6 = vector.broadcast %cst_5 : f32 to vector<8x256xf32>
    %7 = arith.maximumf %5, %6 : vector<8x256xf32>
    %8 = arith.truncf %7 : vector<8x256xf32> to vector<8x256xbf16>
    %c0_6 = arith.constant 0 : index
    %c0_7 = arith.constant 0 : index
    %9 = vector.load %arg4[%c0_6, %c0_7] : memref<256x128xbf16, #tpu.memory_space<vmem>>, vector<256x128xbf16>
    %cst_8 = arith.constant dense<0.000000e+00> : vector<8x128xf32>
    %10 = tpu.matmul %8, %9, %cst_8 {dimension_numbers = #tpu.dot_dimension_numbers<[1], [0], [0], [1], [0, 0, 1, 1], [], []>} : vector<8x256xbf16>, vector<256x128xbf16>, vector<8x128xf32> -> vector<8x128xf32>
    %c0_9 = arith.constant 0 : index
    %c0_10 = arith.constant 0 : index
    %11 = vector.load %arg5[%c0_9, %c0_10] : memref<1x128xf32, #tpu.memory_space<vmem>>, vector<1x128xf32>
    %12 = vector.broadcast %11 : vector<1x128xf32> to vector<8x128xf32>
    %13 = arith.addf %10, %12 : vector<8x128xf32>
    %cst_11 = arith.constant 0.000000e+00 : f32
    %14 = vector.broadcast %cst_11 : f32 to vector<8x128xf32>
    %15 = arith.maximumf %13, %14 : vector<8x128xf32>
    %16 = arith.truncf %15 : vector<8x128xf32> to vector<8x128xbf16>
    %c0_12 = arith.constant 0 : index
    %c0_13 = arith.constant 0 : index
    %17 = vector.load %arg6[%c0_12, %c0_13] : memref<128x64xbf16, #tpu.memory_space<vmem>>, vector<128x64xbf16>
    %cst_14 = arith.constant dense<0.000000e+00> : vector<8x64xf32>
    %18 = tpu.matmul %16, %17, %cst_14 {dimension_numbers = #tpu.dot_dimension_numbers<[1], [0], [0], [1], [0, 0, 1, 1], [], []>} : vector<8x128xbf16>, vector<128x64xbf16>, vector<8x64xf32> -> vector<8x64xf32>
    %c0_15 = arith.constant 0 : index
    %c0_16 = arith.constant 0 : index
    %19 = vector.load %arg7[%c0_15, %c0_16] : memref<1x64xf32, #tpu.memory_space<vmem>>, vector<1x64xf32>
    %20 = vector.broadcast %19 : vector<1x64xf32> to vector<8x64xf32>
    %21 = arith.addf %18, %20 : vector<8x64xf32>
    %cst_17 = arith.constant 0.000000e+00 : f32
    %22 = vector.broadcast %cst_17 : f32 to vector<8x64xf32>
    %23 = arith.maximumf %21, %22 : vector<8x64xf32>
    %c0_18 = arith.constant 0 : index
    %c0_19 = arith.constant 0 : index
    %24 = vector.load %arg8[%c0_18, %c0_19] : memref<1x64xf32, #tpu.memory_space<vmem>>, vector<1x64xf32>
    %25 = vector.broadcast %24 : vector<1x64xf32> to vector<8x64xf32>
    %26 = arith.mulf %23, %25 : vector<8x64xf32>
    %cst_20 = arith.constant dense<0.000000e+00> : vector<8xf32>
    %27 = vector.multi_reduction <add>, %26, %cst_20 [1] : vector<8x64xf32> to vector<8xf32>
    %28 = vector.shape_cast %27 : vector<8xf32> to vector<8x1xf32>
    %c0_21 = arith.constant 0 : index
    %c0_22 = arith.constant 0 : index
    %29 = vector.load %arg9[%c0_21, %c0_22] : memref<1x1xf32, #tpu.memory_space<vmem>>, vector<1x1xf32>
    %30 = vector.broadcast %29 : vector<1x1xf32> to vector<8x1xf32>
    %31 = arith.addf %28, %30 : vector<8x1xf32>
    %c0_23 = arith.constant 0 : index
    %c0_24 = arith.constant 0 : index
    %32 = vector.load %arg10[%c0_23, %c0_24] : memref<8x1xf32, #tpu.memory_space<vmem>>, vector<8x1xf32>
    tpu.vector_store %arg10[%c0_23, %c0_24], %31 {strides = array<i32>} : memref<8x1xf32, #tpu.memory_space<vmem>>, vector<8x1xf32>,
    return
  }
  func.func @transform_0(%arg0: i32) -> (i32, i32) {
    %c0_i32 = arith.constant 0 : i32
    %c0_i32_0 = arith.constant 0 : i32
    return %arg0, %c0_i32 : i32, i32
  }
  func.func @transform_1(%arg0: i32) -> (i32, i32) {
    %c0_i32 = arith.constant 0 : i32
    %c0_i32_0 = arith.constant 0 : i32
    %c0_i32_1 = arith.constant 0 : i32
    return %c0_i32, %c0_i32_0 : i32, i32
  }
  func.func @transform_2(%arg0: i32) -> (i32, i32) {
    %c0_i32 = arith.constant 0 : i32
    %c0_i32_0 = arith.constant 0 : i32
    %c0_i32_1 = arith.constant 0 : i32
    return %c0_i32, %c0_i32_0 : i32, i32
  }
  func.func @transform_3(%arg0: i32) -> (i32, i32) {
    %c0_i32 = arith.constant 0 : i32
    %c0_i32_0 = arith.constant 0 : i32
    %c0_i32_1 = arith.constant 0 : i32
    return %c0_i32, %c0_i32_0 : i32, i32
  }
  func.func @transform_4(%arg0: i32) -> (i32, i32) {
    %c0_i32 = arith.constant 0 : i32
    %c0_i32_0 = arith.constant 0 : i32
    %c0_i32_1 = arith.constant 0 : i32
    return %c0_i32, %c0_i32_0 : i32, i32
  }
  func.func @transform_5(%arg0: i32) -> (i32, i32) {
    %c0_i32 = arith.constant 0 : i32
    %c0_i32_0 = arith.constant 0 : i32
    %c0_i32_1 = arith.constant 0 : i32
    return %c0_i32, %c0_i32_0 : i32, i32
  }
  func.func @transform_6(%arg0: i32) -> (i32, i32) {
    %c0_i32 = arith.constant 0 : i32
    %c0_i32_0 = arith.constant 0 : i32
    %c0_i32_1 = arith.constant 0 : i32
    return %c0_i32, %c0_i32_0 : i32, i32
  }
  func.func @transform_7(%arg0: i32) -> (i32, i32) {
    %c0_i32 = arith.constant 0 : i32
    %c0_i32_0 = arith.constant 0 : i32
    %c0_i32_1 = arith.constant 0 : i32
    return %c0_i32, %c0_i32_0 : i32, i32
  }
  func.func @transform_8(%arg0: i32) -> (i32, i32) {
    %c0_i32 = arith.constant 0 : i32
    %c0_i32_0 = arith.constant 0 : i32
    %c0_i32_1 = arith.constant 0 : i32
    return %c0_i32, %c0_i32_0 : i32, i32
  }
  func.func @transform_9(%arg0: i32) -> (i32, i32) {
    %c0_i32 = arith.constant 0 : i32
    %c0_i32_0 = arith.constant 0 : i32
    return %arg0, %c0_i32 : i32, i32
  }
}

</mosaic_0001>

<bundles_post_ra>
// kernel: squeeze.0
= control target key start
LH: loop header
LB: loop body
LE: loop exit
PB: predicated region body
PF: predicated region fallthrough
CT: control target
= control target key end

     0   :  { %s504_s18 = smov 12  ;;  %s506_s19 = smov 48  ;;  %vm197_vm0 = vcmask 1043458   ;;  %vm201_vm1 = vcmask 1045508   ;;  %vm203_vm2 = vcmask 39936   ;;  %vm220_vm3 = vcmask 490936   ;;  %s538_s0 = inlined_call_operand.vmem [shape: bf16[2,3,12,5,1], index: 0, kind: input, shape index: {}]   ;;  %s539_s1 = inlined_call_operand.vmem [shape: bf16[6,60], index: 1, kind: output, shape index: {}]  }
   0x1   :  { %v445_v0 = vld [vmem:[%s538_s0 + $0x28] sm:$0xff]   ;;  %v446_v1 = vld [vmem:[%s538_s0 + $0x20] sm:$0xff]   ;;  %v447_v2 = vld [vmem:[%s538_s0 + $0x18] sm:$0xff]   ;;  %s240_s20 = smov 3  ;;  %s243_s21 = smov 12  ;;  %vm237_vm4 = vcmask 449936  }
   0x2   :  { %v424_v3 = vunpack.c.h.bf16 %v445_v0  ;;  %v428_v4 = vunpack.c.h.bf16 %v446_v1  ;;  %v432_v5 = vunpack.c.h.bf16 %v447_v2  ;;  %v448_v6 = vld [vmem:[%s538_s0 + $0x10] sm:$0xff]   ;;  %v449_v7 = vld [vmem:[%s538_s0 + $0x8] sm:$0xff]   ;;  %v442_v8 = vld [vmem:[%s538_s0] sm:$0xff]   ;;  %v423_v9 = vunpack.c.l.bf16 %v445_v0  ;;  %s502_s0 = smov 3  ;;  %s248_s22 = smov 48 }
   0x3   :  { %v436_v10 = vunpack.c.h.bf16 %v448_v6  ;;  %v440_v11 = vunpack.c.h.bf16 %v449_v7  ;;  %v444_v12 = vunpack.c.h.bf16 %v442_v8  ;;  %v427_v13 = vunpack.c.l.bf16 %v446_v1  ;;  %s223_s23 = smov 3  ;;  %s226_s24 = smov 12 }
   0x4   :  { %20 = vst [vmem:[#allocation1 + $0x58] sm:$0xff] %v424_v3  ;;  %52 = vst [vmem:[#allocation1 + $0x48] sm:$0xff] %v428_v4  ;;  %v431_v14 = vunpack.c.l.bf16 %v447_v2  ;;  %v435_v15 = vunpack.c.l.bf16 %v448_v6  ;;  %v439_v16 = vunpack.c.l.bf16 %v449_v7  ;;  %v443_v17 = vunpack.c.l.bf16 %v442_v8  ;;  %s231_s25 = smov 48  ;;  %s257_s26 = smov 3 }
   0x5   :  { %84 = vst [vmem:[#allocation1 + $0x38] sm:$0xff] %v432_v5  ;;  %36 = vst [vmem:[#allocation1 + $0x50] sm:$0xff] %v423_v9  ;;  %s260_s27 = smov 12  ;;  %s265_s28 = smov 48  ;;  %vm254_vm5 = vcmask 408936   ;;  %vm271_vm6 = vcmask 367936  }
   0x6   :  { %116 = vst [vmem:[#allocation1 + $0x28] sm:$0xff] %v436_v10  ;;  %148 = vst [vmem:[#allocation1 + $0x18] sm:$0xff] %v440_v11  ;;  %s274_s29 = smov 3  ;;  %s277_s30 = smov 12  ;;  %vm288_vm7 = vcmask 326936   ;;  %vm305_vm8 = vcmask 285936  }
   0x7   :  { %179 = vst [vmem:[#allocation1 + $0x8] sm:$0xff] %v444_v12  ;;  %68 = vst [vmem:[#allocation1 + $0x40] sm:$0xff] %v427_v13  ;;  %s282_s2 = smov 48  ;;  %s291_s3 = smov 3  ;;  %vm322_vm9 = vcmask 244936   ;;  %vm339_vm10 = vcmask 203936  }
   0x8   :  { %100 = vst [vmem:[#allocation1 + $0x30] sm:$0xff] %v431_v14  ;;  %132 = vst [vmem:[#allocation1 + $0x20] sm:$0xff] %v435_v15  ;;  %s462_s4 = smov 55   ;;  %s463_s5 = smov 45   ;;  %vm356_vm11 = vcmask 162936   ;;  %vm373_vm12 = vcmask 121936  }
   0x9   :  { %164 = vst [vmem:[#allocation1 + $0x10] sm:$0xff] %v439_v16  ;;  %192 = vst [vmem:[#allocation1] sm:$0xff] %v443_v17  ;;  %s294_s6 = smov 12  ;;  %s299_s7 = smov 48  ;;  %vm390_vm13 = vcmask 80936  }
   0xa   :  { %s308_s8 = smov 3  ;;  %s464_s9 = smov 50  }
   0xb   :  { %s311_s10 = smov 12  ;;  %s316_s11 = smov 48 }
   0xc   :  { %s465_s12 = smov 40   ;;  %s325_s13 = smov 3 }
   0xd   :  { %s328_s14 = smov 12  ;;  %s333_s15 = smov 48 }
   0xe   :  { %v207_v18 = vld [vmem:[#allocation1 + $0xb] ss:$16 sm:%s502_s0]   ;;  %v241_v22 = vld [vmem:[#allocation1 + $0x9] ss:$16 sm:%s240_s20]   ;;  %v224_v27 = vld [vmem:[#allocation1 + $0xa] ss:$16 sm:%s223_s23]  }
   0xf   :  { %v210_v19 = vld [vmem:[#allocation1 + $0xb] ss:$16 sm:%s504_s18]   ;;  %v244_v23 = vld [vmem:[#allocation1 + $0x9] ss:$16 sm:%s243_s21]   ;;  %v227_v28 = vld [vmem:[#allocation1 + $0xa] ss:$16 sm:%s226_s24]  }
  0x10   :  { %v215_v20 = vld [vmem:[#allocation1 + $0xb] ss:$16 sm:%s506_s19]   ;;  %v212_v21 = vsel %vm197_vm0, %v210_v19, %v207_v18  ;;  %v249_v24 = vld [vmem:[#allocation1 + $0x9] ss:$16 sm:%s248_s22]   ;;  %v246_v26 = vsel %vm197_vm0, %v244_v23, %v241_v22  ;;  %v232_v29 = vld [vmem:[#allocation1 + $0xa] ss:$16 sm:%s231_s25]   ;;  %v229_v31 = vsel %vm197_vm0, %v227_v28, %v224_v27 }
  0x11   :  { %v217_v25 = vsel %vm201_vm1, %v215_v20, %v212_v21  ;;  %v251_v30 = vsel %vm201_vm1, %v249_v24, %v246_v26  ;;  %v258_v32 = vld [vmem:[#allocation1 + $0x8] ss:$16 sm:%s257_s26]   ;;  %v234_v35 = vsel %vm201_vm1, %v232_v29, %v229_v31  ;;  %v275_v37 = vld [vmem:[#allocation1 + $0x7] ss:$16 sm:%s274_s29]   ;;  %v292_v42 = vld [vmem:[#allocation1 + $0x6] ss:$16 sm:%s291_s3]  }
  0x12   :  { %218 = vrot.lane.b32.xlu0 %v217_v25, %s462_s4  ;;  %v261_v33 = vld [vmem:[#allocation1 + $0x8] ss:$16 sm:%s260_s27]   ;;  %252 = vrot.lane.b32.xlu1 %v251_v30, %s463_s5  ;;  %v278_v38 = vld [vmem:[#allocation1 + $0x7] ss:$16 sm:%s277_s30]   ;;  %s342_s16 = smov 3  ;;  %s466_s17 = smov 35  }
  0x13   :  { %v266_v34 = vld [vmem:[#allocation1 + $0x8] ss:$16 sm:%s265_s28]   ;;  %v263_v36 = vsel %vm197_vm0, %v261_v33, %v258_v32  ;;  %v280_v40 = vsel %vm197_vm0, %v278_v38, %v275_v37  ;;  %v283_v41 = vld [vmem:[#allocation1 + $0x7] ss:$16 sm:%s282_s2]   ;;  %v295_v43 = vld [vmem:[#allocation1 + $0x6] ss:$16 sm:%s294_s6]  }
  0x14   :  { %v268_v39 = vsel %vm201_vm1, %v266_v34, %v263_v36  ;;  %v300_v44 = vld [vmem:[#allocation1 + $0x6] ss:$16 sm:%s299_s7]   ;;  %v297_v45 = vsel %vm197_vm0, %v295_v43, %v292_v42  ;;  %v309_v46 = vld [vmem:[#allocation1 + $0x5] ss:$16 sm:%s308_s8]   ;;  %v285_v47 = vsel %vm201_vm1, %v283_v41, %v280_v40  ;;  %v326_v52 = vld [vmem:[#allocation1 + $0x4] ss:$16 sm:%s325_s13]  }
  0x15   :  { %v312_v48 = vld [vmem:[#allocation1 + $0x5] ss:$16 sm:%s311_s10]   ;;  %v302_v49 = vsel %vm201_vm1, %v300_v44, %v297_v45  ;;  %v329_v53 = vld [vmem:[#allocation1 + $0x4] ss:$16 sm:%s328_s14]   ;;  %v343_v56 = vld [vmem:[#allocation1 + $0x3] ss:$16 sm:%s342_s16]  }
  0x16   :  { %235 = vrot.lane.b32.xlu0 %v234_v35, %s464_s9  ;;  %269 = vrot.lane.b32.xlu1 %v268_v39, %s465_s12  ;;  %v314_v50 = vsel %vm197_vm0, %v312_v48, %v309_v46  ;;  %v317_v51 = vld [vmem:[#allocation1 + $0x5] ss:$16 sm:%s316_s11]   ;;  %v334_v54 = vld [vmem:[#allocation1 + $0x4] ss:$16 sm:%s333_s15]   ;;  %v331_v55 = vsel %vm197_vm0, %v329_v53, %v326_v52  ;;  %s345_s0 = smov 12  ;;  %s350_s18 = smov 48 }
  0x17   :  { %s467_s19 = smov 30   ;;  %v319_v57 = vsel %vm201_vm1, %v317_v51, %v314_v50  ;;  %v346_v58 = vld [vmem:[#allocation1 + $0x3] ss:$16 sm:%s345_s0]   ;;  %s359_s20 = smov 3  ;;  %v336_v59 = vsel %vm201_vm1, %v334_v54, %v331_v55  ;;  %v473_v26 = vmov 0.0  }
  0x18   :  { %v348_v60 = vsel %vm197_vm0, %v346_v58, %v343_v56  ;;  %v351_v61 = vld [vmem:[#allocation1 + $0x3] ss:$16 sm:%s350_s18]   ;;  %v360_v62 = vld [vmem:[#allocation1 + $0x2] ss:$16 sm:%s359_s20]   ;;  %s362_s21 = smov 12  ;;  %s367_s22 = smov 48 }
  0x19   :  { %v363_v63 = vld [vmem:[#allocation1 + $0x2] ss:$16 sm:%s362_s21]   ;;  %s376_s23 = smov 3  ;;  %s468_s24 = smov 25   ;;  %v353_v3 = vsel %vm201_vm1, %v351_v61, %v348_v60 }
  0x1a   :  { %286 = vrot.lane.b32.xlu0 %v285_v47, %s466_s17  ;;  %303 = vrot.lane.b32.xlu1 %v302_v49, %s467_s19  ;;  %v368_v0 = vld [vmem:[#allocation1 + $0x2] ss:$16 sm:%s367_s22]   ;;  %v365_v1 = vsel %vm197_vm0, %v363_v63, %v360_v62  ;;  %v377_v2 = vld [vmem:[#allocation1 + $0x1] ss:$16 sm:%s376_s23]   ;;  %s379_s25 = smov 12  ;;  %s384_s26 = smov 48 }
  0x1b   :  { %s469_s27 = smov 20   ;;  %v380_v4 = vld [vmem:[#allocation1 + $0x1] ss:$16 sm:%s379_s25]   ;;  %s193_s28 = smov 3  ;;  %v370_v5 = vsel %vm201_vm1, %v368_v0, %v365_v1 }
  0x1c   :  { %v382_v6 = vsel %vm197_vm0, %v380_v4, %v377_v2  ;;  %v385_v7 = vld [vmem:[#allocation1 + $0x1] ss:$16 sm:%s384_s26]   ;;  %s195_s29 = smov 12  ;;  %s199_s30 = smov 48  ;;  %v194_v8 = vld [vmem:[#allocation1] ss:$16 sm:%s193_s28]  }
  0x1d   :  { %v196_v9 = vld [vmem:[#allocation1] ss:$16 sm:%s195_s29]   ;;  %s470_s2 = smov 15   ;;  %s471_s3 = smov 10   ;;  %v387_v12 = vsel %vm201_vm1, %v385_v7, %v382_v6 }
  0x1e   :  { %320 = vrot.lane.b32.xlu0 %v319_v57, %s468_s24  ;;  %337 = vrot.lane.b32.xlu1 %v336_v59, %s469_s27  ;;  %v200_v10 = vld [vmem:[#allocation1] ss:$16 sm:%s199_s30]   ;;  %v198_v11 = vsel %vm197_vm0, %v196_v9, %v194_v8  ;;  %s472_s4 = smov 5  }
  0x1f   :  { %v202_v13 = vsel %vm201_vm1, %v200_v10, %v198_v11 }
  0x20   :  { %204 = vst.msk [vmem:[#allocation0] sm:$0x3f] %vm203_vm2, %v202_v13  }
  0x22   :  { %354 = vrot.lane.b32.xlu0 %v353_v3, %s470_s2  ;;  %371 = vrot.lane.b32.xlu1 %v370_v5, %s471_s3 }
  0x26   :  { %388 = vrot.lane.b32.xlu0 %v387_v12, %s472_s4 }
  0x84   :  { %v219_v14 = vpop.permute.xlu0 %218   ;;  %v253_v15 = vpop.permute.xlu1 %252  }
  0x85   :  { %221 = vst.msk [vmem:[#allocation0] sm:$0x3f] %vm220_vm3, %v219_v14  }
  0x88   :  { %v236_v16 = vpop.permute.xlu0 %235   ;;  %v270_v17 = vpop.permute.xlu1 %269  }
  0x89   :  { %238 = vst.msk [vmem:[#allocation0] sm:$0x3f] %vm237_vm4, %v236_v16  }
  0x8a   :  { %255 = vst.msk [vmem:[#allocation0] sm:$0x3f] %vm254_vm5, %v253_v15  }
  0x8b   :  { %272 = vst.msk [vmem:[#allocation0] sm:$0x3f] %vm271_vm6, %v270_v17  }
  0x8c   :  { %v287_v18 = vpop.permute.xlu0 %286   ;;  %v304_v19 = vpop.permute.xlu1 %303  }
  0x8d   :  { %289 = vst.msk [vmem:[#allocation0] sm:$0x3f] %vm288_vm7, %v287_v18  }
  0x8e   :  { %306 = vst.msk [vmem:[#allocation0] sm:$0x3f] %vm305_vm8, %v304_v19  }
  0x90   :  { %v321_v20 = vpop.permute.xlu0 %320   ;;  %v338_v21 = vpop.permute.xlu1 %337  }
  0x91   :  { %323 = vst.msk [vmem:[#allocation0] sm:$0x3f] %vm322_vm9, %v321_v20  }
  0x92   :  { %340 = vst.msk [vmem:[#allocation0] sm:$0x3f] %vm339_vm10, %v338_v21  }
  0x94   :  { %v355_v22 = vpop.permute.xlu0 %354   ;;  %v372_v23 = vpop.permute.xlu1 %371  }
  0x95   :  { %357 = vst.msk [vmem:[#allocation0] sm:$0x3f] %vm356_vm11, %v355_v22  }
  0x96   :  { %374 = vst.msk [vmem:[#allocation0] sm:$0x3f] %vm373_vm12, %v372_v23  }
  0x98   :  { %v389_v24 = vpop.permute.xlu0 %388  }
  0x99   :  { %391 = vst.msk [vmem:[#allocation0] sm:$0x3f] %vm390_vm13, %v389_v24  }
  0xa0   :  { %v396_v25 = vld [vmem:[#allocation0] sm:$0xff] }
  0xa1   :  { %v397_v27 = vpack.c.bf16 %v473_v26, %v396_v25 }
  0xa3   :  { %399 = vst [vmem:[%s539_s1] sm:$0xf] %v397_v27 }

// kernel: _critic_forward_jit.1
= control target key start
LH: loop header
LB: loop body
LE: loop exit
PB: predicated region body
PF: predicated region fallthrough
CT: control target
= control target key end

     0   :  { %v586_v1 = vmov 0   ;;  %vm96_vm0 = vcmask 523264   ;;  %v587_v26 = vmov 0.0   ;;  %v46_v33 = vlaneseq  ;;  %s758_s1 = inlined_call_operand.vmem [shape: bf16[64,256], index: 1, kind: input, shape index: {}]   ;;  %s759_s3 = inlined_call_operand.vmem [shape: bf16[256,128], index: 3, kind: input, shape index: {}]   ;;  %s760_s0 = inlined_call_operand.vmem [shape: bf16[8,64], index: 0, kind: input, shape index: {}]   ;;  %s761_s5 = inlined_call_operand.vmem [shape: bf16[128,64], index: 5, kind: input, shape index: {}]   ;;  %s762_s2 = inlined_call_operand.vmem [shape: f32[1,256], index: 2, kind: input, shape index: {}]   ;;  %s763_s4 = inlined_call_operand.vmem [shape: f32[1,128], index: 4, kind: input, shape index: {}]   ;;  %s764_s8 = inlined_call_operand.<no memory space> [shape: f32[1,1], index: 8, kind: input, shape index: {}]   ;;  %s765_s6 = inlined_call_operand.vmem [shape: f32[1,64], index: 6, kind: input, shape index: {}]   ;;  %s766_s7 = inlined_call_operand.vmem [shape: f32[1,64], index: 7, kind: input, shape index: {}]   ;;  %s767_s9 = inlined_call_operand.vmem [shape: f32[8,1], index: 9, kind: output, shape index: {}]  }
   0x1   :  { %v550_v0 = vld [vmem:[%s758_s1 + $0x4] ss:$8 sps:$4 sm:$0xff]   ;;  %132 = vmatprep.mubr.bf16.mxu0 %v586_v1  ;;  %v552_v2 = vld [vmem:[%s758_s1] ss:$8 sps:$4 sm:$0xff]   ;;  %v553_v3 = vld [vmem:[%s758_s1 + $0x14] ss:$8 sps:$4 sm:$0xff]   ;;  %v14_v61 = vstv %s764_s8 }
   0x2   :  { %100 = vmatprep.subr.bf16.mxu0 %v550_v0  ;;  %v555_v4 = vld [vmem:[%s758_s1 + $0x10] ss:$8 sps:$4 sm:$0xff]   ;;  %v556_v5 = vld [vmem:[%s758_s1 + $0x24] ss:$8 sps:$4 sm:$0xff]   ;;  %v558_v6 = vld [vmem:[%s758_s1 + $0x20] ss:$8 sps:$4 sm:$0xff]  }
   0x3   :  { %101 = vmatpush1.bf16.msra.mxu0 %v552_v2  ;;  %v559_v7 = vld [vmem:[%s758_s1 + $0x34] ss:$8 sps:$4 sm:$0xff]   ;;  %v562_v8 = vld [vmem:[%s759_s3 + $0x40] sm:$0xff]   ;;  %v564_v10 = vld [vmem:[%s759_s3 + $0x48] sm:$0xff]   ;;  %v47_v34 = vshrl.u32 %v46_v33, 7  ;;  %vm588_vm1 = vmmov 0  }
   0x4   :  { %102 = vmatprep.subr.bf16.mxu0 %v553_v3  ;;  %v563_v9 = vld [vmem:[%s759_s3] sm:$0xff]   ;;  %496 = vmatprep.subr.bf16.mxu1 %v562_v8  ;;  %v565_v11 = vld [vmem:[%s759_s3 + $0x8] sm:$0xff]   ;;  %v566_v12 = vld [vmem:[%s759_s3 + $0x50] sm:$0xff]   ;;  %15 = vst [vmem:[#allocation2] sm:$0x1] %v14_v61  ;;  %vm453_vm2 = vcmask 7168  }
   0x5   :  { %497 = vmatpush3.bf16.msra.mxu1 %v563_v9  ;;  %v561_v13 = vld [vmem:[%s758_s1 + $0x30] ss:$8 sps:$4 sm:$0xff]   ;;  %v35_v16 = vld [vmem:[%s760_s0] sm:$0xf]  ;;  %v572_v20 = vld [vmem:[%s759_s3 + $0x68] sm:$0xff]   ;;  %v48_v35 = vsub.s32 0, %v47_v34 }
   0x6   :  { %498 = vmatprep.subr.bf16.mxu1 %v564_v10  ;;  %v567_v14 = vld [vmem:[%s759_s3 + $0x10] sm:$0xff]   ;;  %v568_v15 = vld [vmem:[%s759_s3 + $0x58] sm:$0xff]   ;;  %v570_v18 = vld [vmem:[%s759_s3 + $0x60] sm:$0xff]   ;;  %v52_v37 = vsub.s32 1, %v47_v34 }
   0x7   :  { %103 = vmatpush1.bf16.msra.mxu0 %v555_v4  ;;  %v569_v17 = vld [vmem:[%s759_s3 + $0x18] sm:$0xff]   ;;  %v571_v19 = vld [vmem:[%s759_s3 + $0x20] sm:$0xff]   ;;  %v573_v21 = vld [vmem:[%s759_s3 + $0x28] sm:$0xff]  }
   0x8   :  { %104 = vmatprep.subr.bf16.mxu0 %v556_v5  ;;  %v574_v22 = vld [vmem:[%s759_s3 + $0x70] sm:$0xff]   ;;  %v576_v24 = vld [vmem:[%s759_s3 + $0x78] sm:$0xff]   ;;  %v578_v27 = vld [vmem:[%s761_s5] sm:$0xff]  }
   0x9   :  { %499 = vmatpush3.bf16.msra.mxu1 %v565_v11  ;;  %v575_v23 = vld [vmem:[%s759_s3 + $0x30] sm:$0xff]   ;;  %v577_v25 = vld [vmem:[%s759_s3 + $0x38] sm:$0xff]   ;;  %v579_v28 = vld [vmem:[%s761_s5 + $0x8] sm:$0xff]  }
   0xa   :  { %500 = vmatprep.subr.bf16.mxu1 %v566_v12  ;;  %v580_v29 = vld [vmem:[%s761_s5 + $0x10] sm:$0xff]   ;;  %v581_v30 = vld [vmem:[%s761_s5 + $0x18] sm:$0xff]   ;;  %v582_v31 = vld [vmem:[%s761_s5 + $0x20] sm:$0xff]  }
   0xb   :  { %105 = vmatpush1.bf16.msra.mxu0 %v558_v6  ;;  %v583_v32 = vld [vmem:[%s761_s5 + $0x28] sm:$0xff]   ;;  %v44_v36 = vld [vmem:[%s762_s2] sm:$0x3]  ;;  %v584_v50 = vld [vmem:[%s761_s5 + $0x30] sm:$0xff]  }
   0xc   :  { %106 = vmatprep.subr.bf16.mxu0 %v559_v7  ;;  %v49_v38 = vrot.slane %v44_v36, %v48_v35  ;;  %v53_v39 = vrot.slane %v44_v36, %v52_v37  ;;  %v585_v51 = vld [vmem:[%s761_s5 + $0x38] sm:$0xff]   ;;  %v468_v53 = vld [vmem:[%s763_s4] ss:$0 sm:$0xff] }
   0xd   :  { %501 = vmatpush3.bf16.msra.mxu1 %v567_v14  ;;  %v485_v62 = vld [vmem:[%s765_s6] ss:$0 sm:$0xff] }
   0xe   :  { %502 = vmatprep.subr.bf16.mxu1 %v568_v15  ;;  %v494_v3 = vld [vmem:[%s766_s7] ss:$0 sm:$0xff] }
   0xf   :  { %107 = vmatpush1.bf16.msra.mxu0 %v561_v13  ;;  %v495_v8 = vld [vmem:[#allocation2] ss:$0 sm:$0xff] }
  0x10   :  { %527 = vmatprep.subr.bf16.mxu0 %v587_v26 }
  0x11   :  { %503 = vmatpush3.bf16.msra.mxu1 %v569_v17 }
  0x12   :  { %467 = vmatmul.mubr.msk.bf16.vlgmr.msra.gmra.mrb[0].mxu0 %vm96_vm0, %v35_v16  ;;  %504 = vmatprep.subr.bf16.mxu1 %v570_v18 }
  0x13   :  { %528 = vmatpush3.bf16.msra.mxu0 %v578_v27  ;;  %543 = vmatprep.mubr.msk.bf16.mxu0 %vm588_vm1, %v587_v26 }
  0x14   :  { %529 = vmatprep.subr.bf16.mxu0 %v587_v26 }
  0x15   :  { %505 = vmatpush3.bf16.msra.mxu1 %v571_v19 }
  0x16   :  { %506 = vmatprep.subr.bf16.mxu1 %v572_v20 }
  0x17   :  { %530 = vmatpush3.bf16.msra.mxu0 %v579_v28 }
  0x18   :  { %531 = vmatprep.subr.bf16.mxu0 %v587_v26 }
  0x19   :  { %507 = vmatpush3.bf16.msra.mxu1 %v573_v21 }
  0x1a   :  { %508 = vmatprep.subr.bf16.mxu1 %v574_v22 }
  0x1b   :  { %532 = vmatpush3.bf16.msra.mxu0 %v580_v29 }
  0x1c   :  { %533 = vmatprep.subr.bf16.mxu0 %v587_v26 }
  0x1d   :  { %509 = vmatpush3.bf16.msra.mxu1 %v575_v23 }
  0x1e   :  { %510 = vmatprep.subr.bf16.mxu1 %v576_v24 }
  0x1f   :  { %534 = vmatpush3.bf16.msra.mxu0 %v581_v30 }
  0x20   :  { %535 = vmatprep.subr.bf16.mxu0 %v587_v26 }
  0x21   :  { %511 = vmatpush3.bf16.msra.mxu1 %v577_v25 }
  0x23   :  { %536 = vmatpush3.bf16.msra.mxu0 %v582_v31 }
  0x24   :  { %537 = vmatprep.subr.bf16.mxu0 %v587_v26 }
  0x27   :  { %538 = vmatpush3.bf16.msra.mxu0 %v583_v32 }
  0x28   :  { %539 = vmatprep.subr.bf16.mxu0 %v587_v26 }
  0x2b   :  { %540 = vmatpush3.bf16.msra.mxu0 %v584_v50 }
  0x2c   :  { %541 = vmatprep.subr.bf16.mxu0 %v587_v26 }
  0x2f   :  { %542 = vmatpush3.bf16.msra.mxu0 %v585_v51 }
  0xe5   :  { %v134_v40 = vpop.f32.mrb[0].mxu0 }
  0xe6   :  { %v135_v41 = vadd.f32 %v134_v40, %v49_v38  ;;  %v136_v42 = vpop.f32.mrb[1].mxu0 }
  0xe7   :  { %v137_v43 = vadd.f32 %v136_v42, %v53_v39  ;;  %v138_v44 = vpop.f32.mrb[2].mxu0 }
  0xe8   :  { %v141_v45 = vmax.f32 %v135_v41, 0.0  ;;  %v139_v46 = vpop.f32.mrb[3].mxu0 }
  0xe9   :  { %v142_v47 = vmax.f32 %v137_v43, 0.0 }
  0xea   :  { %v143_v49 = vpack.c.bf16 %v141_v45, %v141_v45 }
  0xeb   :  { %v144_v48 = vpack.c.bf16 %v142_v47, %v142_v47 }
  0xed   :  { %312 = vmatprep.mubr.bf16.mxu1 %v144_v48 }
  0xee   :  { %313 = vmatmul.mubr.bf16.vlgmr.msra.gmra.mrb[0].mxu1 %v143_v49 }
 0x1c1   :  { %v512_v52 = vpop.f32.mrb[0].mxu1 }
 0x1c2   :  { %v513_v54 = vpop.f32.mrb[1].mxu1 }
 0x1c3   :  { %v514_v55 = vadd.f32 %v513_v54, %v512_v52  ;;  %v515_v56 = vpop.f32.mrb[2].mxu1 }
 0x1c4   :  { %v516_v57 = vpop.f32.mrb[3].mxu1 }
 0x1c5   :  { %v315_v58 = vadd.f32 %v514_v55, %v468_v53 }
 0x1c7   :  { %v320_v59 = vmax.f32 %v315_v58, 0.0 }
 0x1c9   :  { %v321_v60 = vpack.c.bf16 %v320_v59, %v320_v59 }
 0x1cb   :  { %544 = vmatmul.mubr.bf16.vlgmr.msra.gmra.mrb[4].mxu0 %v321_v60 }
 0x29e   :  { %v427_v63 = vpop.f32.mrb[4].mxu0 }
 0x29f   :  { %v428_v0 = vadd.f32 %v485_v62, %v427_v63  ;;  %v545_v1 = vpop.f32.mrb[5].mxu0 }
 0x2a0   :  { %v430_v2 = vpop.f32.mrb[6].mxu0 }
 0x2a1   :  { %v433_v4 = vmax.f32 %v428_v0, 0.0  ;;  %v546_v5 = vpop.f32.mrb[7].mxu0 }
 0x2a3   :  { %v441_v6 = vmul.f32 %v494_v3, %v433_v4 }
 0x2a5   :  { %v442_v7 = vsel %vm96_vm0, %v441_v6, 0.0 }
 0x2a6   :  { %443 = vadd.xlane.f32.xlu0 %v442_v7 }
 0x333   :  { %v444_v9 = vpop.xlane.xlu0 %443 }
 0x334   :  { %v452_v10 = vadd.f32 %v495_v8, %v444_v9 }
 0x336   :  { %454 = vst.msk [vmem:[%s767_s9] sm:$0xff] %vm453_vm2, %v452_v10 }

</bundles_post_ra>
